<compile_context>
chip_gen: v7x
topology: tpu7x:2x2x1
jax: 0.10.0
libtpu: 0.0.40
codegen_flags: <defaults>
</compile_context>

<pallas_src>
import jax
import jax.numpy as jnp
from jax.experimental import pallas as pl
from jax.experimental.pallas import tpu as pltpu


# --------------------------------------------------------------------------
# Small helpers
# --------------------------------------------------------------------------
def _round_up(x, m):
    return ((x + m - 1) // m) * m


def _sublane_multiple(itemsize):
    # Sub-32-bit dtypes pack along sublanes: 8 rows for 4-byte, 16 for 2-byte,
    # 32 for 1-byte.  Used only for VMEM byte estimates.
    return max(8, 32 // max(int(itemsize), 1))


def _vmem_limits():
    """(scoped_vmem_limit_bytes, pipelined_working_set_budget_bytes)."""
    phys = 64 * 1024 * 1024
    try:
        info = pltpu.get_tpu_info()
        v = getattr(info, "vmem_capacity_bytes", None)
        if v:
            phys = int(v)
    except Exception:
        pass
    # v5e/v6e (128 MiB physical) -> 64 MiB scoped; v7x (64 MiB) -> 32 MiB.
    scoped = min(phys // 2, 64 * 1024 * 1024)
    budget = (scoped * 3) // 4          # headroom for Mosaic internal scratch
    return scoped, budget


def _largest_tile(axis_len, mult, fits):
    """Largest tile that is either the full axis or a multiple of `mult` and
    satisfies fits(tile); bottoms out at `mult` (or the full, small axis)."""
    if fits(axis_len) or axis_len <= mult:
        return axis_len
    t = (axis_len // mult) * mult
    while t > mult and not fits(t):
        t = max(mult, (t // 2 // mult) * mult)
    return t


# --------------------------------------------------------------------------
# Kernels
# --------------------------------------------------------------------------
def _transpose_kernel(x_ref, o_ref):
    # x_ref: (tdim, tP) -- lane-dense along the flattened spatial axis.
    # o_ref: (tP, tdim) -- lane-dense whenever tdim is a multiple of 128.
    o_ref[...] = x_ref[...].T


def _make_interleave_kernel(dim):
    def kernel(x_ref, p_ref, o_ref, acc_ref):
        # x_ref:   (dim, tH, W)        input rows for this tile
        # p_ref:   (dim, W, W*dim)     one-hot scatter (resident; constant idx)
        # o_ref:   (tH, W*dim)         lane-dense output block
        # acc_ref: (tH, W*dim) f32     accumulator scratch
        acc_ref[...] = jnp.dot(x_ref[0], p_ref[0],
                               preferred_element_type=jnp.float32)
        for d in range(1, dim):       # static unroll; dim <= 64 on this path
            acc_ref[...] += jnp.dot(x_ref[d], p_ref[d],
                                    preferred_element_type=jnp.float32)
        o_ref[...] = acc_ref[...].astype(o_ref.dtype)
    return kernel


# --------------------------------------------------------------------------
# Tile pickers (byte-budgeted, dtype-packing aware)
# --------------------------------------------------------------------------
def _pick_transpose_tiles(dim, P, itemsize, budget, step_cap):
    sub = _sublane_multiple(itemsize)

    def step_bytes(td, tp):
        in_b = _round_up(td, sub) * _round_up(tp, 128)     # (td, tp) block
        out_b = _round_up(tp, sub) * _round_up(td, 128)    # (tp, td) block
        return (in_b + out_b) * itemsize

    def fits(td, tp):
        s = step_bytes(td, tp)
        return s <= step_cap and 2 * s <= budget           # double-buffered

    tdim = dim
    tP = _largest_tile(P, 128, lambda t: fits(tdim, t))
    if not fits(tdim, tP):
        # dim alone blows the budget (e.g. dim ~ 32K f32): tile dim as well.
        tdim = _largest_tile(dim, 128, lambda t: fits(t, 128))
        tP = _largest_tile(P, 128, lambda t: fits(tdim, t))

    # Feed both v7x TensorCores when the whole problem fits in one tile.
    if tP == P and tdim == dim and P >= 256:
        tP = _round_up(-(-P // 2), 128)
    return tdim, tP


def _pick_rows_tile(dim, H, W, itemsize, budget, step_cap, scatter_buf_bytes):
    sub = _sublane_multiple(itemsize)
    Wd = W * dim

    def step_bytes(th):
        in_b = dim * _round_up(th, sub) * _round_up(W, 128) * itemsize
        out_b = _round_up(th, sub) * _round_up(Wd, 128) * itemsize
        return in_b + out_b

    def fits(th):
        s = step_bytes(th)
        scratch = _round_up(th, 8) * _round_up(Wd, 128) * 4   # f32 accumulator
        return (s <= step_cap
                and 2 * (s + scatter_buf_bytes) + scratch <= budget)

    tH = _largest_tile(H, sub, fits)
    # Feed both v7x TensorCores when the whole problem fits in one tile.
    if tH == H and H >= 2 * sub:
        tH = _round_up(-(-H // 2), sub)
    return tH


# --------------------------------------------------------------------------
# Wrapper
# --------------------------------------------------------------------------
def permute_out(x, dim):
    """JAX/Pallas equivalent of permute_out(dim).forward(x).

    x: 5-D array with x.size == dim * x.shape[3] * x.shape[4]
    returns array of shape (x.shape[3], x.shape[4], dim)
    """
    H, W = int(x.shape[3]), int(x.shape[4])
    P = H * W
    dtype = x.dtype
    itemsize = jnp.dtype(dtype).itemsize
    sub = _sublane_multiple(itemsize)

    scoped_vmem, budget = _vmem_limits()
    step_cap = min(budget // 3, 16 * 1024 * 1024)   # ~8 MiB/step on v7x, 16 on v6e

    # ---------------- small-dim lane-dense output path ----------------
    Wd = W * dim
    scatter_buf = dim * _round_up(W, sub) * _round_up(Wd, 128) * itemsize
    use_dense_small_dim = (
        dtype in (jnp.float32, jnp.bfloat16)   # MXU-friendly, exact 0/1 scatter
        and 1 <= dim <= 64                     # bounds the unrolled dot loop
        and W <= 256                           # keeps scatter flops << HBM roofline
        and Wd <= 2048
        and 2 * scatter_buf <= budget // 3     # scatter tensor stays small & resident
    )

    if use_dense_small_dim:
        x3 = jnp.reshape(x, (dim, H, W))       # contiguous view, free
        # One-hot scatter p[d, w, w*dim + d] = 1 (built once, stays resident in
        # VMEM because its block index is constant across grid steps).
        j = jnp.arange(Wd, dtype=jnp.int32)
        tgt = (jnp.arange(W, dtype=jnp.int32)[None, :, None] * dim
               + jnp.arange(dim, dtype=jnp.int32)[:, None, None])
        p = (j[None, None, :] == tgt).astype(dtype)          # (dim, W, Wd)

        tH = _pick_rows_tile(dim, H, W, itemsize, budget, step_cap, scatter_buf)
        grid = (pl.cdiv(H, tH),)

        out2 = pl.pallas_call(
            _make_interleave_kernel(dim),
            out_shape=jax.ShapeDtypeStruct((H, Wd), dtype),
            grid_spec=pltpu.PrefetchScalarGridSpec(
                num_scalar_prefetch=0,
                grid=grid,
                in_specs=[
                    pl.BlockSpec((dim, tH, W), lambda i: (0, i, 0)),
                    pl.BlockSpec((dim, W, Wd), lambda i: (0, 0, 0)),
                ],
                out_specs=pl.BlockSpec((tH, Wd), lambda i: (i, 0)),
                scratch_shapes=[pltpu.VMEM((tH, Wd), jnp.float32)],
            ),
            compiler_params=pltpu.CompilerParams(
                dimension_semantics=("parallel",),
                vmem_limit_bytes=scoped_vmem),
            cost_estimate=pl.CostEstimate(
                flops=2 * dim * H * W * Wd,
                transcendentals=0,
                bytes_accessed=2 * dim * P * itemsize + scatter_buf),
        )(x3, p)
        # Free contiguous reshape back to (H, W, dim).
        return jnp.reshape(out2, (H, W, dim))

    # ---------------- general 2-D tiled transpose path ----------------
    x2 = jnp.reshape(x, (dim, P))              # contiguous view, free
    tdim, tP = _pick_transpose_tiles(dim, P, itemsize, budget, step_cap)
    grid = (pl.cdiv(P, tP), pl.cdiv(dim, tdim))
    # NOTE: if a v7x trace shows exposed DMA at this tile size, add
    # pipeline_mode=pl.Buffered(3) to the input BlockSpec; if the bundle dump
    # shows XLU/store-slot saturation, chunk the transpose store by 128 lanes.

    out2 = pl.pallas_call(
        _transpose_kernel,
        out_shape=jax.ShapeDtypeStruct((P, dim), dtype),
        grid_spec=pltpu.PrefetchScalarGridSpec(
            num_scalar_prefetch=0,
            grid=grid,
            in_specs=[pl.BlockSpec((tdim, tP), lambda i, j: (j, i))],
            out_specs=pl.BlockSpec((tP, tdim), lambda i, j: (i, j)),
        ),
        compiler_params=pltpu.CompilerParams(
            dimension_semantics=("parallel", "parallel"),
            vmem_limit_bytes=scoped_vmem),
        cost_estimate=pl.CostEstimate(
            flops=0, transcendentals=0,
            bytes_accessed=2 * dim * P * itemsize),
    )(x2)
    return jnp.reshape(out2, (H, W, dim))


# --------------------------------------------------------------------------
# Self-test
# --------------------------------------------------------------------------
if __name__ == "__main__":
    key = jax.random.PRNGKey(0)
    k1, k2 = jax.random.split(key)

    # Test 1: small dim (lane-dense MXU-interleave path).  dim = N*C*D = 8.
    N, C, D, H, W = 2, 2, 2, 32, 32
    dim = N * C * D
    x = jax.random.normal(k1, (N, C, D, H, W), dtype=jnp.float32)
    out = jax.block_until_ready(permute_out(x, dim))
    ref = jnp.transpose(jnp.reshape(x, (dim, H, W)), (1, 2, 0))
    assert out.shape == (H, W, dim), out.shape
    assert jnp.allclose(out, ref), "small-dim path mismatch vs reference"

    # Test 2: large dim (tiled 2-D transpose path).  dim = 4*8*8 = 256.
    N2, C2, D2, H2, W2 = 4, 8, 8, 8, 16
    dim2 = N2 * C2 * D2
    x2 = jax.random.normal(k2, (N2, C2, D2, H2, W2), dtype=jnp.float32)
    out2 = jax.block_until_ready(permute_out(x2, dim2))
    ref2 = jnp.transpose(jnp.reshape(x2, (dim2, H2, W2)), (1, 2, 0))
    assert out2.shape == (H2, W2, dim2), out2.shape
    assert jnp.allclose(out2, ref2), "transpose path mismatch vs reference"

    print("KERNEL_OK")
</pallas_src>

<mosaic_0001>
module attributes {stable_mosaic.version = 11 : i64} {
  func.func @kernel(%arg0: i32, %arg1: memref<8x16x32xf32, #tpu.memory_space<vmem>>, %arg2: memref<8x32x256xf32, #tpu.memory_space<vmem>>, %arg3: memref<16x256xf32, #tpu.memory_space<vmem>>, %arg4: memref<16x256xf32, #tpu.memory_space<vmem>>) attributes {dimension_semantics = [#tpu.dimension_semantics<parallel>], iteration_bounds = array<i64: 2>, scalar_prefetch = 0 : i64, scratch_operands = 1 : i64, tpu.core_type = #tpu.core_type<tc>, window_params = [{transform_indices = @transform_0, window_bounds = array<i64: 8, 16, 32>}, {pipeline_mode = #tpu.pipeline_mode<synchronous>, transform_indices = @transform_1, window_bounds = array<i64: 8, 32, 256>}, {transform_indices = @transform_2, window_bounds = array<i64: 16, 256>}]} {
    %c0 = arith.constant 0 : index
    %c0_0 = arith.constant 0 : index
    %c0_1 = arith.constant 0 : index
    %0 = vector.load %arg1[%c0, %c0_0, %c0_1] : memref<8x16x32xf32, #tpu.memory_space<vmem>>, vector<1x16x32xf32>
    %1 = vector.shape_cast %0 : vector<1x16x32xf32> to vector<16x32xf32>
    %c0_2 = arith.constant 0 : index
    %c0_3 = arith.constant 0 : index
    %c0_4 = arith.constant 0 : index
    %2 = vector.load %arg2[%c0_2, %c0_3, %c0_4] : memref<8x32x256xf32, #tpu.memory_space<vmem>>, vector<1x32x256xf32>
    %3 = vector.shape_cast %2 : vector<1x32x256xf32> to vector<32x256xf32>
    %cst = arith.constant dense<0.000000e+00> : vector<16x256xf32>
    %4 = tpu.matmul %1, %3, %cst {dimension_numbers = #tpu.dot_dimension_numbers<[1], [0], [0], [1], [0, 0, 1, 1], [], []>} : vector<16x32xf32>, vector<32x256xf32>, vector<16x256xf32> -> vector<16x256xf32>
    %c0_5 = arith.constant 0 : index
    %c0_6 = arith.constant 0 : index
    %5 = vector.load %arg4[%c0_5, %c0_6] : memref<16x256xf32, #tpu.memory_space<vmem>>, vector<16x256xf32>
    tpu.vector_store %arg4[%c0_5, %c0_6], %4 {strides = array<i32>} : memref<16x256xf32, #tpu.memory_space<vmem>>, vector<16x256xf32>,
    %c0_7 = arith.constant 0 : index
    %c0_8 = arith.constant 0 : index
    %6 = vector.load %arg4[%c0_7, %c0_8] : memref<16x256xf32, #tpu.memory_space<vmem>>, vector<16x256xf32>
    %c1 = arith.constant 1 : index
    %c0_9 = arith.constant 0 : index
    %c0_10 = arith.constant 0 : index
    %7 = vector.load %arg1[%c1, %c0_9, %c0_10] : memref<8x16x32xf32, #tpu.memory_space<vmem>>, vector<1x16x32xf32>
    %8 = vector.shape_cast %7 : vector<1x16x32xf32> to vector<16x32xf32>
    %c1_11 = arith.constant 1 : index
    %c0_12 = arith.constant 0 : index
    %c0_13 = arith.constant 0 : index
    %9 = vector.load %arg2[%c1_11, %c0_12, %c0_13] : memref<8x32x256xf32, #tpu.memory_space<vmem>>, vector<1x32x256xf32>
    %10 = vector.shape_cast %9 : vector<1x32x256xf32> to vector<32x256xf32>
    %cst_14 = arith.constant dense<0.000000e+00> : vector<16x256xf32>
    %11 = tpu.matmul %8, %10, %cst_14 {dimension_numbers = #tpu.dot_dimension_numbers<[1], [0], [0], [1], [0, 0, 1, 1], [], []>} : vector<16x32xf32>, vector<32x256xf32>, vector<16x256xf32> -> vector<16x256xf32>
    %12 = arith.addf %6, %11 : vector<16x256xf32>
    %c0_15 = arith.constant 0 : index
    %c0_16 = arith.constant 0 : index
    %13 = vector.load %arg4[%c0_15, %c0_16] : memref<16x256xf32, #tpu.memory_space<vmem>>, vector<16x256xf32>
    tpu.vector_store %arg4[%c0_15, %c0_16], %12 {strides = array<i32>} : memref<16x256xf32, #tpu.memory_space<vmem>>, vector<16x256xf32>,
    %c0_17 = arith.constant 0 : index
    %c0_18 = arith.constant 0 : index
    %14 = vector.load %arg4[%c0_17, %c0_18] : memref<16x256xf32, #tpu.memory_space<vmem>>, vector<16x256xf32>
    %c2 = arith.constant 2 : index
    %c0_19 = arith.constant 0 : index
    %c0_20 = arith.constant 0 : index
    %15 = vector.load %arg1[%c2, %c0_19, %c0_20] : memref<8x16x32xf32, #tpu.memory_space<vmem>>, vector<1x16x32xf32>
    %16 = vector.shape_cast %15 : vector<1x16x32xf32> to vector<16x32xf32>
    %c2_21 = arith.constant 2 : index
    %c0_22 = arith.constant 0 : index
    %c0_23 = arith.constant 0 : index
    %17 = vector.load %arg2[%c2_21, %c0_22, %c0_23] : memref<8x32x256xf32, #tpu.memory_space<vmem>>, vector<1x32x256xf32>
    %18 = vector.shape_cast %17 : vector<1x32x256xf32> to vector<32x256xf32>
    %cst_24 = arith.constant dense<0.000000e+00> : vector<16x256xf32>
    %19 = tpu.matmul %16, %18, %cst_24 {dimension_numbers = #tpu.dot_dimension_numbers<[1], [0], [0], [1], [0, 0, 1, 1], [], []>} : vector<16x32xf32>, vector<32x256xf32>, vector<16x256xf32> -> vector<16x256xf32>
    %20 = arith.addf %14, %19 : vector<16x256xf32>
    %c0_25 = arith.constant 0 : index
    %c0_26 = arith.constant 0 : index
    %21 = vector.load %arg4[%c0_25, %c0_26] : memref<16x256xf32, #tpu.memory_space<vmem>>, vector<16x256xf32>
    tpu.vector_store %arg4[%c0_25, %c0_26], %20 {strides = array<i32>} : memref<16x256xf32, #tpu.memory_space<vmem>>, vector<16x256xf32>,
    %c0_27 = arith.constant 0 : index
    %c0_28 = arith.constant 0 : index
    %22 = vector.load %arg4[%c0_27, %c0_28] : memref<16x256xf32, #tpu.memory_space<vmem>>, vector<16x256xf32>
    %c3 = arith.constant 3 : index
    %c0_29 = arith.constant 0 : index
    %c0_30 = arith.constant 0 : index
    %23 = vector.load %arg1[%c3, %c0_29, %c0_30] : memref<8x16x32xf32, #tpu.memory_space<vmem>>, vector<1x16x32xf32>
    %24 = vector.shape_cast %23 : vector<1x16x32xf32> to vector<16x32xf32>
    %c3_31 = arith.constant 3 : index
    %c0_32 = arith.constant 0 : index
    %c0_33 = arith.constant 0 : index
    %25 = vector.load %arg2[%c3_31, %c0_32, %c0_33] : memref<8x32x256xf32, #tpu.memory_space<vmem>>, vector<1x32x256xf32>
    %26 = vector.shape_cast %25 : vector<1x32x256xf32> to vector<32x256xf32>
    %cst_34 = arith.constant dense<0.000000e+00> : vector<16x256xf32>
    %27 = tpu.matmul %24, %26, %cst_34 {dimension_numbers = #tpu.dot_dimension_numbers<[1], [0], [0], [1], [0, 0, 1, 1], [], []>} : vector<16x32xf32>, vector<32x256xf32>, vector<16x256xf32> -> vector<16x256xf32>
    %28 = arith.addf %22, %27 : vector<16x256xf32>
    %c0_35 = arith.constant 0 : index
    %c0_36 = arith.constant 0 : index
    %29 = vector.load %arg4[%c0_35, %c0_36] : memref<16x256xf32, #tpu.memory_space<vmem>>, vector<16x256xf32>
    tpu.vector_store %arg4[%c0_35, %c0_36], %28 {strides = array<i32>} : memref<16x256xf32, #tpu.memory_space<vmem>>, vector<16x256xf32>,
    %c0_37 = arith.constant 0 : index
    %c0_38 = arith.constant 0 : index
    %30 = vector.load %arg4[%c0_37, %c0_38] : memref<16x256xf32, #tpu.memory_space<vmem>>, vector<16x256xf32>
    %c4 = arith.constant 4 : index
    %c0_39 = arith.constant 0 : index
    %c0_40 = arith.constant 0 : index
    %31 = vector.load %arg1[%c4, %c0_39, %c0_40] : memref<8x16x32xf32, #tpu.memory_space<vmem>>, vector<1x16x32xf32>
    %32 = vector.shape_cast %31 : vector<1x16x32xf32> to vector<16x32xf32>
    %c4_41 = arith.constant 4 : index
    %c0_42 = arith.constant 0 : index
    %c0_43 = arith.constant 0 : index
    %33 = vector.load %arg2[%c4_41, %c0_42, %c0_43] : memref<8x32x256xf32, #tpu.memory_space<vmem>>, vector<1x32x256xf32>
    %34 = vector.shape_cast %33 : vector<1x32x256xf32> to vector<32x256xf32>
    %cst_44 = arith.constant dense<0.000000e+00> : vector<16x256xf32>
    %35 = tpu.matmul %32, %34, %cst_44 {dimension_numbers = #tpu.dot_dimension_numbers<[1], [0], [0], [1], [0, 0, 1, 1], [], []>} : vector<16x32xf32>, vector<32x256xf32>, vector<16x256xf32> -> vector<16x256xf32>
    %36 = arith.addf %30, %35 : vector<16x256xf32>
    %c0_45 = arith.constant 0 : index
    %c0_46 = arith.constant 0 : index
    %37 = vector.load %arg4[%c0_45, %c0_46] : memref<16x256xf32, #tpu.memory_space<vmem>>, vector<16x256xf32>
    tpu.vector_store %arg4[%c0_45, %c0_46], %36 {strides = array<i32>} : memref<16x256xf32, #tpu.memory_space<vmem>>, vector<16x256xf32>,
    %c0_47 = arith.constant 0 : index
    %c0_48 = arith.constant 0 : index
    %38 = vector.load %arg4[%c0_47, %c0_48] : memref<16x256xf32, #tpu.memory_space<vmem>>, vector<16x256xf32>
    %c5 = arith.constant 5 : index
    %c0_49 = arith.constant 0 : index
    %c0_50 = arith.constant 0 : index
    %39 = vector.load %arg1[%c5, %c0_49, %c0_50] : memref<8x16x32xf32, #tpu.memory_space<vmem>>, vector<1x16x32xf32>
    %40 = vector.shape_cast %39 : vector<1x16x32xf32> to vector<16x32xf32>
    %c5_51 = arith.constant 5 : index
    %c0_52 = arith.constant 0 : index
    %c0_53 = arith.constant 0 : index
    %41 = vector.load %arg2[%c5_51, %c0_52, %c0_53] : memref<8x32x256xf32, #tpu.memory_space<vmem>>, vector<1x32x256xf32>
    %42 = vector.shape_cast %41 : vector<1x32x256xf32> to vector<32x256xf32>
    %cst_54 = arith.constant dense<0.000000e+00> : vector<16x256xf32>
    %43 = tpu.matmul %40, %42, %cst_54 {dimension_numbers = #tpu.dot_dimension_numbers<[1], [0], [0], [1], [0, 0, 1, 1], [], []>} : vector<16x32xf32>, vector<32x256xf32>, vector<16x256xf32> -> vector<16x256xf32>
    %44 = arith.addf %38, %43 : vector<16x256xf32>
    %c0_55 = arith.constant 0 : index
    %c0_56 = arith.constant 0 : index
    %45 = vector.load %arg4[%c0_55, %c0_56] : memref<16x256xf32, #tpu.memory_space<vmem>>, vector<16x256xf32>
    tpu.vector_store %arg4[%c0_55, %c0_56], %44 {strides = array<i32>} : memref<16x256xf32, #tpu.memory_space<vmem>>, vector<16x256xf32>,
    %c0_57 = arith.constant 0 : index
    %c0_58 = arith.constant 0 : index
    %46 = vector.load %arg4[%c0_57, %c0_58] : memref<16x256xf32, #tpu.memory_space<vmem>>, vector<16x256xf32>
    %c6 = arith.constant 6 : index
    %c0_59 = arith.constant 0 : index
    %c0_60 = arith.constant 0 : index
    %47 = vector.load %arg1[%c6, %c0_59, %c0_60] : memref<8x16x32xf32, #tpu.memory_space<vmem>>, vector<1x16x32xf32>
    %48 = vector.shape_cast %47 : vector<1x16x32xf32> to vector<16x32xf32>
    %c6_61 = arith.constant 6 : index
    %c0_62 = arith.constant 0 : index
    %c0_63 = arith.constant 0 : index
    %49 = vector.load %arg2[%c6_61, %c0_62, %c0_63] : memref<8x32x256xf32, #tpu.memory_space<vmem>>, vector<1x32x256xf32>
    %50 = vector.shape_cast %49 : vector<1x32x256xf32> to vector<32x256xf32>
    %cst_64 = arith.constant dense<0.000000e+00> : vector<16x256xf32>
    %51 = tpu.matmul %48, %50, %cst_64 {dimension_numbers = #tpu.dot_dimension_numbers<[1], [0], [0], [1], [0, 0, 1, 1], [], []>} : vector<16x32xf32>, vector<32x256xf32>, vector<16x256xf32> -> vector<16x256xf32>
    %52 = arith.addf %46, %51 : vector<16x256xf32>
    %c0_65 = arith.constant 0 : index
    %c0_66 = arith.constant 0 : index
    %53 = vector.load %arg4[%c0_65, %c0_66] : memref<16x256xf32, #tpu.memory_space<vmem>>, vector<16x256xf32>
    tpu.vector_store %arg4[%c0_65, %c0_66], %52 {strides = array<i32>} : memref<16x256xf32, #tpu.memory_space<vmem>>, vector<16x256xf32>,
    %c0_67 = arith.constant 0 : index
    %c0_68 = arith.constant 0 : index
    %54 = vector.load %arg4[%c0_67, %c0_68] : memref<16x256xf32, #tpu.memory_space<vmem>>, vector<16x256xf32>
    %c7 = arith.constant 7 : index
    %c0_69 = arith.constant 0 : index
    %c0_70 = arith.constant 0 : index
    %55 = vector.load %arg1[%c7, %c0_69, %c0_70] : memref<8x16x32xf32, #tpu.memory_space<vmem>>, vector<1x16x32xf32>
    %56 = vector.shape_cast %55 : vector<1x16x32xf32> to vector<16x32xf32>
    %c7_71 = arith.constant 7 : index
    %c0_72 = arith.constant 0 : index
    %c0_73 = arith.constant 0 : index
    %57 = vector.load %arg2[%c7_71, %c0_72, %c0_73] : memref<8x32x256xf32, #tpu.memory_space<vmem>>, vector<1x32x256xf32>
    %58 = vector.shape_cast %57 : vector<1x32x256xf32> to vector<32x256xf32>
    %cst_74 = arith.constant dense<0.000000e+00> : vector<16x256xf32>
    %59 = tpu.matmul %56, %58, %cst_74 {dimension_numbers = #tpu.dot_dimension_numbers<[1], [0], [0], [1], [0, 0, 1, 1], [], []>} : vector<16x32xf32>, vector<32x256xf32>, vector<16x256xf32> -> vector<16x256xf32>
    %60 = arith.addf %54, %59 : vector<16x256xf32>
    %c0_75 = arith.constant 0 : index
    %c0_76 = arith.constant 0 : index
    %61 = vector.load %arg4[%c0_75, %c0_76] : memref<16x256xf32, #tpu.memory_space<vmem>>, vector<16x256xf32>
    tpu.vector_store %arg4[%c0_75, %c0_76], %60 {strides = array<i32>} : memref<16x256xf32, #tpu.memory_space<vmem>>, vector<16x256xf32>,
    %c0_77 = arith.constant 0 : index
    %c0_78 = arith.constant 0 : index
    %62 = vector.load %arg4[%c0_77, %c0_78] : memref<16x256xf32, #tpu.memory_space<vmem>>, vector<16x256xf32>
    %c0_79 = arith.constant 0 : index
    %c0_80 = arith.constant 0 : index
    %63 = vector.load %arg3[%c0_79, %c0_80] : memref<16x256xf32, #tpu.memory_space<vmem>>, vector<16x256xf32>
    tpu.vector_store %arg3[%c0_79, %c0_80], %62 {strides = array<i32>} : memref<16x256xf32, #tpu.memory_space<vmem>>, vector<16x256xf32>,
    return
  }
  func.func @transform_0(%arg0: i32) -> (i32, i32, i32) {
    %c0_i32 = arith.constant 0 : i32
    %c0_i32_0 = arith.constant 0 : i32
    %c0_i32_1 = arith.constant 0 : i32
    return %c0_i32, %arg0, %c0_i32_0 : i32, i32, i32
  }
  func.func @transform_1(%arg0: i32) -> (i32, i32, i32) {
    %c0_i32 = arith.constant 0 : i32
    %c0_i32_0 = arith.constant 0 : i32
    %c0_i32_1 = arith.constant 0 : i32
    %c0_i32_2 = arith.constant 0 : i32
    return %c0_i32, %c0_i32_0, %c0_i32_1 : i32, i32, i32
  }
  func.func @transform_2(%arg0: i32) -> (i32, i32) {
    %c0_i32 = arith.constant 0 : i32
    %c0_i32_0 = arith.constant 0 : i32
    return %arg0, %c0_i32 : i32, i32
  }
}

</mosaic_0001>

<bundles_post_ra>
// kernel: tpu_custom_call.1
= control target key start
LH: loop header
LB: loop body
LE: loop exit
PB: predicated region body
PF: predicated region fallthrough
CT: control target
= control target key end

     0   :  { %7 = vsyncpa [#allocation4], 0  ;;  %s1727_s0 = inlined_call_operand.hbm [shape: f32[8,32,32], index: 0, kind: input, shape index: {}]   ;;  %s1728_s1 = inlined_call_operand.hbm [shape: f32[8,32,256], index: 1, kind: input, shape index: {}]   ;;  %s1729_s2 = inlined_call_operand.hbm [shape: f32[32,256], index: 2, kind: output, shape index: {}]  }
   0x1   :  { %9 = vsyncpa [#allocation4 + $0x1], 0 }
   0x2   :  { %10 = vsyncpa [#allocation7], 0 }
   0x3   :  { %11 = vsyncpa [#allocation5], 0 }
   0x4   :  { %13 = vsyncpa [#allocation5 + $0x1], 0  ;;  %s1499_s9 = smov 0   ;;  %s1501_s10 = smov 0  }
   0x5   :  { %s1503_s11 = smov 0   ;;  %s1505_s12 = smov 0  }
   0x6 LB: > { %s1520_s13 = sadd.s32 4294967295, %s1469_s12   ;;  %s1157_s14 = sadd.s32 4294967294, %s1469_s12   ;;  %s1469_s12 = sphi %s1505_s12, %s1751_s12   ;;  %s1465_s11 = sphi %s1503_s11, %s1750_s11   ;;  %s1461_s10 = sphi %s1501_s10, %s1749_s10   ;;  %s1457_s9 = sphi %s1499_s9, %s1748_s9  }
   0x7   : > { %s1524_s15 = sadd.s32 1, %s1469_s12   ;;  %s26_s16 = sadd.s32 1, %s1465_s11 }
   0x8   : > { %s23_s17 = ssub.s32 %s1469_s12, %s1524_s15  ;;  %p33_p0 = scmp.ne.s32.totalorder %s1465_s11, %s1461_s10 }
   0x9   : > { %p24_p1 = scmp.eq.s32.totalorder %s23_s17, 0  ;;  %p34_p2 = scmp.eq.s32.totalorder %s1469_s12, 0 }
   0xa   : > { %p39_p3 = scmp.ne.s32.totalorder %s1461_s10, %s1457_s9  ;;  %p1730_p4 = scmp.eq.s32.totalorder %s1520_s13, 0 }
   0xb   : > { %s1536_s18 = scalar_select %p24_p1, %s1465_s11, %s26_s16  }
   0xc   : > { %p1538_p5 = por %p34_p2, %p33_p0  ;;  %p1544_p6 = por %p1730_p4, %p39_p3 }
   0xd   : > { %p84_p7 = scmp.eq.s32.totalorder %s1520_s13, 1  ;;  %p90_p8 = scmp.eq.s32.totalorder %s1157_s14, 1 }
   0xe   : > { %s1735_s19 = scalar_select %p1538_p5, 1, 0 }
   0xf   : > { %s1736_s20 = scalar_select %p1544_p6, 1, 0 }
  0x10   : > { %p1158_p9 = scmp.ge.s32.totalorder %s1469_s12, 1  ;;  %p97_p10 = scmp.lt.s32.totalorder %s1469_s12, 3 }
  0x11   : > { %p1551_p11 = por %p84_p7, %p33_p0  ;;  %p1555_p12 = por %p90_p8, %p39_p3 }
  0x12   : > { %p1559_p13 = pnand %p1158_p9, %p97_p10  ;;  %s1471_s24 = smov [#allocation6]  }
  0x13   : > { %s1737_s21 = scalar_select %p1551_p11, 1, 0 }
  0x14   : > { %s1738_s22 = scalar_select %p1555_p12, 1, 0 }
  0x15   : > { %s1739_s23 = scalar_select %p1559_p13, 1, 0 }
  0x16   : > { %p1316_p1 = pneg %p1559_p13  ;;  %s109_s25 = sshll.u32 %s1471_s24, 4  ;;  %s110_s25 = int_to_ptr.vmem [resolvable:$true] %s109_s25 }
  0x17   : > { %s1371_s29 = scalar_lea.hbm %s1728_s1, 8192 }
  0x18   : > { %p1567_p2 = pnand %p1316_p1, %p1730_p4  ;;  %p1372_p0 = scmp.ne.s32.totalorder %s1728_s1, %s1371_s29 }
  0x19   : > { %p1378_p9 = scmp.lt.u32.totalorder %s1371_s29, %s1728_s1 }
  0x1a   : > { %p1373_p3 = pneg %p1567_p2 }
  0x1c   : > { %p1374_p7 = pnand %p1373_p3, %p1372_p0 }
  0x1e   : > { %p1375_p8 = pneg %p1374_p7 }
  0x20   : > { %p1380_p10 = pnand %p1378_p9, %p1375_p8 }
  0x22   : > { %1383 = shalt.err (!%p1380_p10)
}
  0x23   : > { %s1384_s6 = scalar_lea.vmem %s110_s25, 8192  ;;  %p1392_p11 = scmp.lt.s32.totalorder %s110_s25, %s110_s25 }
  0x24   : > { %p1385_p1 = scmp.ne.s32.totalorder %s110_s25, %s1384_s6  ;;  %p1393_p6 = scmp.lt.s32.totalorder %s1384_s6, %s1384_s6 }
  0x26   : > { %p1387_p4 = pnand %p1385_p1, %p1373_p3  ;;  %p1394_p13 = por %p1393_p6, %p1392_p11 }
  0x28   : > { %p1388_p12 = pneg %p1387_p4 }
  0x2a   : > { %p1395_p5 = pnand %p1394_p13, %p1388_p12 }
  0x2c   : > { %1398 = shalt.err (!%p1395_p5)
}
  0x2d   : > { %s1472_s7 = smov 256   ;;  %s1473_s8 = smov 16  }
  0x2e   : > { %1319 = dma.hbm_to_vmem [thread:$0]  (!%p1567_p2), %s1728_s1, 8192, %s110_s25, [#allocation7], %s1472_s7, %s1472_s7, %s1473_s8  }
  0x2f   : > { %p1160_p0 = scmp.ge.s32.totalorder %s1469_s12, 2 }
  0x31   : > { %119 = sbr.rel (%p1160_p0) target bundleno = 71 (0x47), region = 20 }
  0x38   : > { %s123_s17 = sand.u32 1, %s1465_s11   ;;  %s1206_s24 = sshll.u32 %s1469_s12, 8 }
  0x39   : > { %s1161_s26 = sshll.u32 %s123_s17, 7  ;;  %s133_s25 = scalar_lea.hbm %s1727_s0, %s1206_s24 }
  0x3a   : > { %p1741_p4 = scmp.ne.s32.totalorder %s1735_s19, 0  ;;  %s127_s30 = scalar_lea.vmem [#allocation3], %s1161_s26 }
  0x3b   : > { %s146_s3 = sshll.u32 %s127_s30, 4  ;;  %s1474_s5 = smov 512   ;;  %s147_s3 = int_to_ptr.vmem [resolvable:$true] %s146_s3 }
  0x3c   : > { %s1303_s29 = scalar_select %p1741_p4, [#allocation0], [#allocation11] }
  0x3d   : > { %1304 = sst [smem:[#allocation10]] (%p1741_p4), %s1474_s5  ;;  %s1475_s6 = smov 256  }
  0x3e   : > { %s138_s4 = sld [smem:[%s1303_s29]]   ;;  %s1476_s7 = smov 2  }
  0x3f   : > { %1305 = sst [smem:[#allocation10 + $0x1]] (%p1741_p4), %s1475_s6  ;;  %s1477_s8 = smov 128  }
  0x40   : > { %1306 = sst [smem:[#allocation10 + $0x2]] (%p1741_p4), %s1476_s7  ;;  %s1478_s16 = smov 8  }
  0x41   : > { %1307 = sst [smem:[#allocation10 + $0x3]] (%p1741_p4), %s1477_s8  ;;  %s124_s26 = scalar_lea.sflag [#allocation4], %s123_s17 }
  0x42   : > { %1308 = sst [smem:[#allocation10 + $0x4]] (%p1741_p4), %s1477_s8  ;;  %s1479_s27 = smov [#allocation9]  }
  0x43   : > { %1309 = sst [smem:[#allocation10 + $0x5]] (%p1741_p4), %s1478_s16 }
  0x44   : > { %s1164_s14 = sshll.u32 %s138_s4, 26 }
  0x45   : > { %s1165_s24 = sadd.s32 134217728, %s1164_s14 }
  0x46   : > { %1310 = dma.general (%p1741_p4), %s133_s25, 2048, %s147_s3, %s124_s26, %s1479_s27, [#allocation10], %s1165_s24, 0  }
  0x47 PF: > { %p1742_p5 = scmp.ne.s32.totalorder %s1739_s23, 0 }
  0x48   : > { %s1614_s28 = sand.u32 (!%p1742_p5), 1, %s1461_s10   ;;  %p1743_p6 = scmp.ne.s32.totalorder (!%p1742_p5), %s1736_s20, 0 }
  0x49   : > { %171 = sbr.rel (%p1742_p5) target bundleno = 355 (0x163), region = 28  ;;  %s1167_s29 = sshll.u32 (!%p1742_p5), %s1614_s28, 7 }
  0x4a   : > { %s174_s30 = scalar_lea.sflag (!%p1742_p5), [#allocation4], %s1614_s28  ;;  %s1618_s4 = scalar_lea.vmem (!%p1742_p5), [#allocation3], %s1167_s29 }
  0x50   : > { %1444 = dma.done.wait (%p1743_p6), %s174_s30, 2048  }
  0x51   : > { %1446 = vsyncadd (%p1743_p6), %s174_s30, 4294965248  ;;  %p1744_p11 = scmp.eq.s32.totalorder %s1520_s13, 0 }
  0x53   : > { %1448 = dma.done.wait (%p1744_p11), [#allocation7], 8192   ;;  %p1745_p12 = pmov %p1744_p11 }
  0x54   : > { %v1480_v0 = vmov 0.0   ;;  %v207_v1 = vld [vmem:[#allocation6 + $0x8] sm:$0xff]  ;;  %v209_v2 = vld [vmem:[#allocation6 + $0x18] sm:$0xff]  ;;  %v206_v6 = vld [vmem:[#allocation6] sm:$0xff]  ;;  %vm214_vm0 = vcmask 261120   ;;  %s1169_s19 = sshll.u32 %s1614_s28, 5 }
  0x55   : > { %1450 = vsyncadd (%p1745_p12), [#allocation7], 4294959104  ;;  %285 = vmatprep.mubr.f32.mxu1 %v1480_v0  ;;  %709 = vmatprep.mubr.f32.mxu0 %v1480_v0  ;;  %v632_v3 = vld [vmem:[#allocation6 + $0x108] sm:$0xff]  ;;  %v1209_v4 = vpack.c.bf16 %v209_v2, %v207_v1  ;;  %v634_v5 = vld [vmem:[#allocation6 + $0x118] sm:$0xff]  ;;  %s201_s20 = scalar_lea.vmem [#allocation8], %s1169_s19  ;;  %s1208_s17 = sshll.u32 %s1520_s13, 9 }
  0x56   : > { %v208_v7 = vld [vmem:[#allocation6 + $0x10] sm:$0xff]  ;;  %v1241_v8 = vpack.c.bf16 %v634_v5, %v632_v3  ;;  %v631_v10 = vld [vmem:[#allocation6 + $0x100] sm:$0xff]  ;;  %v211_v12 = vld [vmem:[#allocation6 + $0x28] sm:$0xff]  ;;  %s1074_s23 = sshll.u32 %s201_s20, 4  ;;  %s1683_s5 = scalar_lea.hbm %s1729_s2, %s1208_s17  ;;  %s1678_s23 = int_to_ptr.vmem [resolvable:$true] %s1074_s23 }
  0x57   : > { %v1211_v9 = vpack.c.bf16 %v208_v7, %v206_v6  ;;  %v633_v11 = vld [vmem:[#allocation6 + $0x110] sm:$0xff]  ;;  %1210 = vmatprep.subr.bf16.mxu1 %v1209_v4  ;;  %v213_v14 = vld [vmem:[#allocation6 + $0x38] sm:$0xff]  ;;  %v636_v15 = vld [vmem:[#allocation6 + $0x128] sm:$0xff]  ;;  %s1060_s13 = scalar_lea.sflag [#allocation5], %s1614_s28  ;;  %s1399_s6 = scalar_lea.vmem %s1678_s23, 512 }
  0x58   : > { %v1243_v13 = vpack.c.bf16 %v633_v11, %v631_v10  ;;  %v638_v16 = vld [vmem:[#allocation6 + $0x138] sm:$0xff]  ;;  %1242 = vmatprep.subr.bf16.mxu0 %v1241_v8  ;;  %v1213_v17 = vpack.c.bf16 %v213_v14, %v211_v12  ;;  %v210_v19 = vld [vmem:[#allocation6 + $0x20] sm:$0xff]  ;;  %v212_v20 = vld [vmem:[#allocation6 + $0x30] sm:$0xff]  ;;  %p1400_p13 = scmp.ne.s32.totalorder %s1678_s23, %s1399_s6  ;;  %p1746_p2 = scmp.ne.s32.totalorder %s1737_s21, 0 }
  0x59   : > { %1212 = vmatpush1.bf16.msra.mxu1 %v1211_v9  ;;  %v1245_v18 = vpack.c.bf16 %v638_v16, %v636_v15  ;;  %v635_v21 = vld [vmem:[#allocation6 + $0x120] sm:$0xff]  ;;  %v1215_v22 = vpack.c.bf16 %v212_v20, %v210_v19  ;;  %v637_v23 = vld [vmem:[#allocation6 + $0x130] sm:$0xff]  ;;  %v311_v24 = vld [vmem:[#allocation6 + $0x48] sm:$0xff]  ;;  %s1481_s7 = smov [#allocation8]  }
  0x5a   : > { %1244 = vmatpush1.bf16.msra.mxu0 %v1243_v13  ;;  %1214 = vmatprep.subr.bf16.mxu1 %v1213_v17  ;;  %v1247_v25 = vpack.c.bf16 %v637_v23, %v635_v21  ;;  %v313_v26 = vld [vmem:[#allocation6 + $0x58] sm:$0xff]  ;;  %v739_v27 = vld [vmem:[#allocation6 + $0x148] sm:$0xff]  ;;  %v310_v30 = vld [vmem:[#allocation6 + $0x40] sm:$0xff]  ;;  %p1401_p3 = pnand %p1400_p13, %p1746_p2  ;;  %s1403_s8 = sshll.u32 %s1481_s7, 4  ;;  %s1404_s8 = int_to_ptr.vmem [resolvable:$false] %s1403_s8 }
  0x5b   : > { %1246 = vmatprep.subr.bf16.mxu0 %v1245_v18  ;;  %v1217_v28 = vpack.c.bf16 %v313_v26, %v311_v24  ;;  %v741_v29 = vld [vmem:[#allocation6 + $0x158] sm:$0xff]  ;;  %v312_v31 = vld [vmem:[#allocation6 + $0x50] sm:$0xff]  ;;  %v204_v32 = vld [vmem:[%s1618_s4] sm:$0xff]  ;;  %s1405_s14 = scalar_lea.vmem %s1404_s8, 1024  ;;  %p1406_p8 = scmp.lt.s32.totalorder %s1678_s23, %s1404_s8 }
  0x5c   : > { %v1249_v33 = vpack.c.bf16 %v741_v29, %v739_v27  ;;  %v1219_v34 = vpack.c.bf16 %v312_v31, %v310_v30  ;;  %v738_v35 = vld [vmem:[#allocation6 + $0x140] sm:$0xff]  ;;  %v740_v36 = vld [vmem:[#allocation6 + $0x150] sm:$0xff]  ;;  %v315_v39 = vld [vmem:[#allocation6 + $0x68] sm:$0xff]  ;;  %p1402_p7 = pneg %p1401_p3  ;;  %p1407_p9 = scmp.lt.s32.totalorder %s1405_s14, %s1399_s6 }
  0x5d   : > { %1216 = vmatpush1.bf16.msra.mxu1 %v1215_v22  ;;  %v1184_v37 = vld [vmem:[%s1618_s4 + $0x40] sm:$0xff]  ;;  %v1251_v38 = vpack.c.bf16 %v740_v36, %v738_v35  ;;  %v317_v40 = vld [vmem:[#allocation6 + $0x78] sm:$0xff]  ;;  %v743_v42 = vld [vmem:[#allocation6 + $0x168] sm:$0xff] }
  0x5e   : > { %1248 = vmatpush1.bf16.msra.mxu0 %v1247_v25  ;;  %1218 = vmatprep.subr.bf16.mxu1 %v1217_v28  ;;  %v1221_v41 = vpack.c.bf16 %v317_v40, %v315_v39  ;;  %v745_v43 = vld [vmem:[#allocation6 + $0x178] sm:$0xff]  ;;  %v314_v44 = vld [vmem:[#allocation6 + $0x60] sm:$0xff]  ;;  %v316_v46 = vld [vmem:[#allocation6 + $0x70] sm:$0xff]  ;;  %p1408_p10 = por %p1407_p9, %p1406_p8 }
  0x5f   : > { %1250 = vmatprep.subr.bf16.mxu0 %v1249_v33  ;;  %v1253_v45 = vpack.c.bf16 %v745_v43, %v743_v42  ;;  %v742_v47 = vld [vmem:[#allocation6 + $0x160] sm:$0xff]  ;;  %v744_v48 = vld [vmem:[#allocation6 + $0x170] sm:$0xff]  ;;  %v205_v49 = vld [vmem:[%s1618_s4 + $0x8] sm:$0xff]  ;;  %v1223_v50 = vpack.c.bf16 %v316_v46, %v314_v44 }
  0x60   : > { %1170 = vmatmul.mubr.msk.f32.vlgmr.msra.gmra.mrb[0].mxu1 %vm214_vm0, %v204_v32  ;;  %v418_v51 = vld [vmem:[#allocation6 + $0x88] sm:$0xff]  ;;  %v420_v52 = vld [vmem:[#allocation6 + $0x98] sm:$0xff]  ;;  %v1255_v54 = vpack.c.bf16 %v744_v48, %v742_v47  ;;  %v417_v58 = vld [vmem:[#allocation6 + $0x80] sm:$0xff]  ;;  %p1409_p1 = pnand %p1408_p10, %p1402_p7 }
  0x61   : > { %1186 = vmatmul.mubr.msk.f32.vlgmr.msra.gmra.mrb[0].mxu0 %vm214_vm0, %v1184_v37  ;;  %1220 = vmatpush1.bf16.msra.mxu1 %v1219_v34  ;;  %v1185_v53 = vld [vmem:[%s1618_s4 + $0x48] sm:$0xff]  ;;  %v848_v56 = vld [vmem:[#allocation6 + $0x198] sm:$0xff]  ;;  %v1225_v57 = vpack.c.bf16 %v420_v52, %v418_v51  ;;  %v419_v59 = vld [vmem:[#allocation6 + $0x90] sm:$0xff] }
  0x62   : > { %1252 = vmatpush1.bf16.msra.mxu0 %v1251_v38  ;;  %291 = vmatprep.mubr.f32.mxu1 %v1480_v0  ;;  %v846_v55 = vld [vmem:[#allocation6 + $0x188] sm:$0xff]  ;;  %v845_v60 = vld [vmem:[#allocation6 + $0x180] sm:$0xff]  ;;  %v1172_v61 = vld [vmem:[%s1618_s4 + $0x10] sm:$0xff]  ;;  %v1227_v3 = vpack.c.bf16 %v419_v59, %v417_v58 }
  0x63   : > { %715 = vmatprep.mubr.f32.mxu0 %v1480_v0  ;;  %1222 = vmatprep.subr.bf16.mxu1 %v1221_v41  ;;  %v1257_v62 = vpack.c.bf16 %v848_v56, %v846_v55  ;;  %v847_v63 = vld [vmem:[#allocation6 + $0x190] sm:$0xff]  ;;  %v422_v1 = vld [vmem:[#allocation6 + $0xa8] sm:$0xff]  ;;  %v424_v4 = vld [vmem:[#allocation6 + $0xb8] sm:$0xff] }
  0x64   : > { %1171 = vmatmul.mubr.msk.f32.gmra.mrb[2].mxu1 %vm214_vm0, %v205_v49  ;;  %1254 = vmatprep.subr.bf16.mxu0 %v1253_v45  ;;  %v1188_v2 = vld [vmem:[%s1618_s4 + $0x50] sm:$0xff]  ;;  %v850_v5 = vld [vmem:[#allocation6 + $0x1a8] sm:$0xff]  ;;  %v1259_v6 = vpack.c.bf16 %v847_v63, %v845_v60  ;;  %v852_v7 = vld [vmem:[#allocation6 + $0x1b8] sm:$0xff]  ;;  %v1229_v10 = vpack.c.bf16 %v424_v4, %v422_v1 }
  0x65   : > { %1187 = vmatmul.mubr.msk.f32.gmra.mrb[2].mxu0 %vm214_vm0, %v1185_v53  ;;  %1224 = vmatpush1.bf16.msra.mxu1 %v1223_v50  ;;  %v421_v8 = vld [vmem:[#allocation6 + $0xa0] sm:$0xff]  ;;  %v423_v9 = vld [vmem:[#allocation6 + $0xb0] sm:$0xff]  ;;  %v1261_v13 = vpack.c.bf16 %v852_v7, %v850_v5  ;;  %v525_v14 = vld [vmem:[#allocation6 + $0xc8] sm:$0xff] }
  0x66   : > { %1256 = vmatpush1.bf16.msra.mxu0 %v1255_v54  ;;  %388 = vmatprep.mubr.f32.mxu1 %v1480_v0  ;;  %v849_v11 = vld [vmem:[#allocation6 + $0x1a0] sm:$0xff]  ;;  %v851_v12 = vld [vmem:[#allocation6 + $0x1b0] sm:$0xff]  ;;  %v527_v15 = vld [vmem:[#allocation6 + $0xd8] sm:$0xff]  ;;  %v1231_v17 = vpack.c.bf16 %v423_v9, %v421_v8 }
  0x67   : > { %816 = vmatprep.mubr.f32.mxu0 %v1480_v0  ;;  %1226 = vmatprep.subr.bf16.mxu1 %v1225_v57  ;;  %v1173_v16 = vld [vmem:[%s1618_s4 + $0x18] sm:$0xff]  ;;  %v953_v18 = vld [vmem:[#allocation6 + $0x1c8] sm:$0xff]  ;;  %v1263_v21 = vpack.c.bf16 %v851_v12, %v849_v11  ;;  %v524_v22 = vld [vmem:[#allocation6 + $0xc0] sm:$0xff]  ;;  %v1233_v24 = vpack.c.bf16 %v527_v15, %v525_v14 }
  0x68   : > { %1174 = vmatmul.mubr.msk.f32.vlgmr.msra.gmra.mrb[0].mxu1 %vm214_vm0, %v1172_v61  ;;  %1258 = vmatprep.subr.bf16.mxu0 %v1257_v62  ;;  %v955_v19 = vld [vmem:[#allocation6 + $0x1d8] sm:$0xff]  ;;  %v526_v23 = vld [vmem:[#allocation6 + $0xd0] sm:$0xff]  ;;  %v952_v25 = vld [vmem:[#allocation6 + $0x1c0] sm:$0xff] }
  0x69   : > { %1190 = vmatmul.mubr.msk.f32.vlgmr.msra.gmra.mrb[0].mxu0 %vm214_vm0, %v1188_v2  ;;  %1228 = vmatpush1.bf16.msra.mxu1 %v1227_v3  ;;  %v1189_v20 = vld [vmem:[%s1618_s4 + $0x58] sm:$0xff]  ;;  %v954_v26 = vld [vmem:[#allocation6 + $0x1d0] sm:$0xff]  ;;  %v1265_v27 = vpack.c.bf16 %v955_v19, %v953_v18  ;;  %v529_v28 = vld [vmem:[#allocation6 + $0xe8] sm:$0xff]  ;;  %v1235_v31 = vpack.c.bf16 %v526_v23, %v524_v22 }
  0x6a   : > { %1260 = vmatpush1.bf16.msra.mxu0 %v1259_v6  ;;  %394 = vmatprep.mubr.f32.mxu1 %v1480_v0  ;;  %v531_v29 = vld [vmem:[#allocation6 + $0xf8] sm:$0xff]  ;;  %v1176_v30 = vld [vmem:[%s1618_s4 + $0x20] sm:$0xff]  ;;  %v957_v32 = vld [vmem:[#allocation6 + $0x1e8] sm:$0xff]  ;;  %v1267_v35 = vpack.c.bf16 %v954_v26, %v952_v25 }
  0x6b   : > { %822 = vmatprep.mubr.f32.mxu0 %v1480_v0  ;;  %1230 = vmatprep.subr.bf16.mxu1 %v1229_v10  ;;  %v959_v33 = vld [vmem:[#allocation6 + $0x1f8] sm:$0xff]  ;;  %v1192_v34 = vld [vmem:[%s1618_s4 + $0x60] sm:$0xff]  ;;  %v530_v37 = vld [vmem:[#allocation6 + $0xf0] sm:$0xff]  ;;  %v1237_v38 = vpack.c.bf16 %v531_v29, %v529_v28 }
  0x6c   : > { %1175 = vmatmul.mubr.msk.f32.gmra.mrb[2].mxu1 %vm214_vm0, %v1173_v16  ;;  %1262 = vmatprep.subr.bf16.mxu0 %v1261_v13  ;;  %v528_v36 = vld [vmem:[#allocation6 + $0xe0] sm:$0xff]  ;;  %v958_v40 = vld [vmem:[#allocation6 + $0x1f0] sm:$0xff]  ;;  %v1269_v41 = vpack.c.bf16 %v959_v33, %v957_v32  ;;  %v1177_v42 = vld [vmem:[%s1618_s4 + $0x28] sm:$0xff] }
  0x6d   : > { %1191 = vmatmul.mubr.msk.f32.gmra.mrb[2].mxu0 %vm214_vm0, %v1189_v20  ;;  %1232 = vmatpush1.bf16.msra.mxu1 %v1231_v17  ;;  %v956_v39 = vld [vmem:[#allocation6 + $0x1e0] sm:$0xff]  ;;  %v1239_v43 = vpack.c.bf16 %v530_v37, %v528_v36  ;;  %v1193_v44 = vld [vmem:[%s1618_s4 + $0x68] sm:$0xff]  ;;  %v1180_v46 = vld [vmem:[%s1618_s4 + $0x30] sm:$0xff] }
  0x6e   : > { %1264 = vmatpush1.bf16.msra.mxu0 %v1263_v21  ;;  %495 = vmatprep.mubr.f32.mxu1 %v1480_v0  ;;  %v1271_v45 = vpack.c.bf16 %v958_v40, %v956_v39  ;;  %v1196_v47 = vld [vmem:[%s1618_s4 + $0x70] sm:$0xff]  ;;  %v1181_v48 = vld [vmem:[%s1618_s4 + $0x38] sm:$0xff] }
  0x6f   : > { %923 = vmatprep.mubr.f32.mxu0 %v1480_v0  ;;  %1234 = vmatprep.subr.bf16.mxu1 %v1233_v24  ;;  %v1197_v49 = vld [vmem:[%s1618_s4 + $0x78] sm:$0xff] }
  0x70   : > { %1178 = vmatmul.mubr.msk.f32.vlgmr.msra.gmra.mrb[0].mxu1 %vm214_vm0, %v1176_v30  ;;  %1266 = vmatprep.subr.bf16.mxu0 %v1265_v27 }
  0x71   : > { %1194 = vmatmul.mubr.msk.f32.vlgmr.msra.gmra.mrb[0].mxu0 %vm214_vm0, %v1192_v34  ;;  %1236 = vmatpush1.bf16.msra.mxu1 %v1235_v31 }
  0x72   : > { %1268 = vmatpush1.bf16.msra.mxu0 %v1267_v35  ;;  %501 = vmatprep.mubr.f32.mxu1 %v1480_v0 }
  0x73   : > { %929 = vmatprep.mubr.f32.mxu0 %v1480_v0  ;;  %1238 = vmatprep.subr.bf16.mxu1 %v1237_v38 }
  0x74   : > { %1179 = vmatmul.mubr.msk.f32.gmra.mrb[2].mxu1 %vm214_vm0, %v1177_v42  ;;  %1270 = vmatprep.subr.bf16.mxu0 %v1269_v41 }
  0x75   : > { %1195 = vmatmul.mubr.msk.f32.gmra.mrb[2].mxu0 %vm214_vm0, %v1193_v44  ;;  %1240 = vmatpush1.bf16.msra.mxu1 %v1239_v43 }
  0x76   : > { %1272 = vmatpush1.bf16.msra.mxu0 %v1271_v45  ;;  %602 = vmatprep.mubr.f32.mxu1 %v1480_v0 }
  0x77   : > { %1030 = vmatprep.mubr.f32.mxu0 %v1480_v0 }
  0x78   : > { %1182 = vmatmul.mubr.msk.f32.vlgmr.msra.gmra.mrb[0].mxu1 %vm214_vm0, %v1180_v46 }
  0x79   : > { %1198 = vmatmul.mubr.msk.f32.vlgmr.msra.gmra.mrb[0].mxu0 %vm214_vm0, %v1196_v47  ;;  %608 = vmatprep.mubr.f32.mxu1 %v1480_v0 }
  0x7a   : > { %1036 = vmatprep.mubr.f32.mxu0 %v1480_v0 }
  0x7c   : > { %1183 = vmatmul.mubr.msk.f32.gmra.mrb[2].mxu1 %vm214_vm0, %v1181_v48 }
  0x7d   : > { %1199 = vmatmul.mubr.msk.f32.gmra.mrb[2].mxu0 %vm214_vm0, %v1197_v49 }
 0x14b   : > { %v604_v50 = vpop.f32.mrb[0].mxu1 }
 0x14c   : > { %v1032_v51 = vpop.f32.mrb[0].mxu0  ;;  %v606_v52 = vpop.f32.mrb[1].mxu1 }
 0x14d   : > { %v1273_v53 = vadd.f32 %v1032_v51, %v604_v50  ;;  %v1034_v54 = vpop.f32.mrb[1].mxu0 }
 0x14e   : > { %v1274_v55 = vadd.f32 %v1034_v54, %v606_v52 }
 0x14f   : > { %1055 = vst [vmem:[%s201_s20] sm:$0xff] %v1273_v53  ;;  %v610_v56 = vpop.f32.mrb[2].mxu1 }
 0x150   : > { %1056 = vst [vmem:[%s201_s20 + $0x8] sm:$0xff] %v1274_v55  ;;  %v1038_v0 = vpop.f32.mrb[2].mxu0  ;;  %v612_v57 = vpop.f32.mrb[3].mxu1 }
 0x151   : > { %v1275_v58 = vadd.f32 %v1038_v0, %v610_v56  ;;  %v1040_v59 = vpop.f32.mrb[3].mxu0 }
 0x152   : > { %v1276_v60 = vadd.f32 %v1040_v59, %v612_v57 }
 0x153   : > { %1057 = vst [vmem:[%s201_s20 + $0x10] sm:$0xff] %v1275_v58 }
 0x154   : > { %1058 = vst [vmem:[%s201_s20 + $0x18] sm:$0xff] %v1276_v60 }
 0x155   : > { %1412 = shalt.err (!%p1409_p1)
}
 0x156   : > { %s1413_s16 = scalar_lea.hbm %s1683_s5, 512  ;;  %s1417_s27 = scalar_lea.hbm %s1729_s2, 1024 }
 0x157   : > { %p1414_p4 = scmp.ne.s32.totalorder %s1683_s5, %s1413_s16  ;;  %p1418_p11 = scmp.lt.u32.totalorder %s1683_s5, %s1729_s2 }
 0x158   : > { %p1419_p12 = scmp.lt.u32.totalorder %s1417_s27, %s1413_s16  ;;  %p1421_p3 = scmp.lt.u32.totalorder %s1413_s16, %s1683_s5 }
 0x159   : > { %p1415_p5 = pnand %p1414_p4, %p1746_p2 }
 0x15a   : > { %p1420_p13 = por %p1419_p12, %p1418_p11 }
 0x15b   : > { %p1416_p6 = pneg %p1415_p5 }
 0x15c   : > { %p1422_p7 = por %p1421_p3, %p1420_p13 }
 0x15e   : > { %p1423_p8 = pnand %p1422_p7, %p1416_p6 }
 0x160   : > { %1426 = shalt.err (!%p1423_p8)
}
 0x161   : > { %s1482_s4 = smov 256   ;;  %s1483_s19 = smov 16  }
 0x162   : > { %1314 = dma.vmem_to_hbm [thread:$0]  (%p1746_p2), %s1678_s23, 512, %s1683_s5, %s1060_s13, %s1482_s4, %s1482_s4, %s1483_s19  }
 0x163 PF: > { %s1089_s20 = sand.u32 1, %s1457_s9   ;;  %p1747_p9 = scmp.ne.s32.totalorder %s1738_s22, 0 }
 0x164   : > { %s1090_s17 = scalar_lea.sflag [#allocation5], %s1089_s20 }
 0x165   : > { %p1321_p10 = pnand %p1160_p0, %p1747_p9 }
 0x167   : > { %1452 = dma.done.wait (!%p1321_p10), %s1090_s17, 512  }
 0x168   : > { %1454 = vsyncadd (!%p1321_p10), %s1090_s17, 4294966784  ;;  %p16_p1 = scmp.ge.s32.totalorder %s1524_s15, 4   ;;  %s1748_s9 = smov %s1461_s10 }
 0x169   : > { %s1749_s10 = smov %s1465_s11  ;;  %s1750_s11 = smov %s1536_s18 }
 0x16a   : > { %s1751_s12 = smov %s1524_s15  ;;  %18 = sbr.rel (!%p16_p1) target bundleno = 6 (0x6), region = 96 }
 0x171   :  { %1095 = vsyncpa [#allocation4], 1 }
 0x172   :  { %1097 = vsyncpa [#allocation4 + $0x1], 1 }
 0x173   :  { %1098 = vsyncpa [#allocation7], 1 }
 0x174   :  { %1099 = vsyncpa [#allocation5], 1 }
 0x175   :  { %1101 = vsyncpa [#allocation5 + $0x1], 1 }

</bundles_post_ra>
